<compile_context>
chip_gen: v7x
topology: tpu7x:2x2x1
jax: 0.10.0
libtpu: 0.0.40
codegen_flags: <defaults>
</compile_context>

<pallas_src>
import functools

import jax
import jax.numpy as jnp
from jax.experimental import pallas as pl
from jax.experimental.pallas import tpu as pltpu


def _round_up(x, m):
    return (x + m - 1) // m * m


def _vmem_limit_bytes():
    # ~3/4 of physical VMEM, clamped to [32 MiB, 96 MiB]:
    #   v5e/v6e (128 MiB) -> 96 MiB, v7x (64 MiB) -> 48 MiB.
    try:
        cap = int(pltpu.get_tpu_info().vmem_capacity_bytes)
    except Exception:
        cap = 64 << 20
    return int(min(max(cap * 3 // 4, 32 << 20), 96 << 20))


def _choose_block_rows(n_rows, d, c, itemsize):
    # Target >= ~2 MiB of xs per grid step (per-step overhead ~0.35 us), but
    # keep the (tn, C) one-hot and f32 temporaries within a VMEM budget.
    target = (2 << 20) // max(1, d * itemsize)
    per_row = 4 * (3 * d + c) + 64            # rough f32 temp bytes per row
    vmem_cap = (16 << 20) // max(1, per_row)
    tn = max(8, min(target, vmem_cap, 8192))
    tn = _round_up(tn, 8)
    return min(tn, _round_up(n_rows, 8))


def _center_loss_kernel(xs_ref, ys_ref, inv_ref, center_hbm, out_ref,
                        center_vmem, acc_ref, *, n_valid, tiles_per_core):
    co = pl.program_id(0)          # core / parallel axis
    i = pl.program_id(1)           # row-tile sweep (reduction axis)
    last = pl.num_programs(1) - 1

    @pl.when(i == 0)
    def _init():
        acc_ref[...] = jnp.zeros_like(acc_ref)
        # Single-buffered resident copy of the center matrix: DMA'd once per
        # core sweep instead of a double-buffered pipelined block.
        pltpu.sync_copy(center_hbm, center_vmem)

    xs = xs_ref[...].astype(jnp.float32)      # (TN, D) f32 for VPU math
    ys = ys_ref[...]                          # (TN, 1) int32 labels
    inv_cnt = inv_ref[...]                    # (TN, 1) f32 precomputed 1/count
    center = center_vmem[...]                 # (C, D) native dtype (MXU input)

    tn = xs.shape[0]
    c = center.shape[0]

    # Global (logical) row ids of this tile; rows past n are masked. The ragged
    # trailing block and any clamped overflow tile only ever hit the mask.
    tile = co * tiles_per_core + i
    row_id = tile * tn + jax.lax.broadcasted_iota(jnp.int32, (tn, 1), 0)
    valid = row_id < n_valid

    # F.normalize(xs): x / max(||x||_2, 1e-12) == x * rsqrt(max(sum_sq, 1e-24)).
    sum_sq = jnp.sum(xs * xs, axis=1, keepdims=True)
    xs_n = xs * jax.lax.rsqrt(jnp.maximum(sum_sq, 1e-24))

    # center.index_select(0, ys) as an MXU one-hot matmul with f32 accumulation;
    # one-hot built directly in center's dtype (single consumer).
    cls_ids = jax.lax.broadcasted_iota(jnp.int32, (tn, c), 1)
    one_hot = (ys == cls_ids).astype(center.dtype)
    center_sel = jnp.dot(one_hot, center, preferred_element_type=jnp.float32)

    diff = xs_n - center_sel
    dist = jnp.sqrt(jnp.sum(diff * diff, axis=1, keepdims=True))   # (TN, 1)

    # Plain vector add per step; padded/garbage rows are select-ed to zero
    # (select, not arithmetic -> NaN/Inf in stale rows cannot leak).
    acc_ref[...] += jnp.where(valid, dist * inv_cnt, 0.0)

    @pl.when(i == last)
    def _finalize():
        total = jnp.sum(acc_ref[...])
        lane = jax.lax.broadcasted_iota(jnp.int32, (1, 128), 1)
        out_ref[...] = jnp.where(lane == 0, total, 0.0)   # lane-dense store


def center_loss(xs, ys, center, *, block_n=None):
    """xs: (N, D) float, ys: (N,) int, center: (C, D) float -> scalar f32 loss."""
    n, d = xs.shape
    c, d2 = center.shape
    assert d == d2, (d, d2)

    ys = ys.astype(jnp.int32)

    # Class histogram via scatter-add (no O(N*C) one-hot); stream 1/count per
    # sample so the kernel does a multiply instead of a gather + divide.
    counts = jnp.bincount(ys, length=c)                          # (C,) int32
    cnt = jnp.maximum(counts[ys].astype(jnp.float32), 1.0)       # (N,)
    inv_cnt = (1.0 / cnt).reshape(n, 1)                          # (N, 1) f32
    ys2d = ys.reshape(n, 1)

    # Only pad when n < 8 (minimum sublane tile); otherwise stream ragged.
    n_rows = n
    if n < 8:
        pad = 8 - n
        xs = jnp.pad(xs, ((0, pad), (0, 0)))
        ys2d = jnp.pad(ys2d, ((0, pad), (0, 0)))
        inv_cnt = jnp.pad(inv_cnt, ((0, pad), (0, 0)))
        n_rows = 8

    if block_n is None:
        tn = _choose_block_rows(n_rows, d, c, xs.dtype.itemsize)
    else:
        tn = min(_round_up(max(block_n, 8), 8), _round_up(n_rows, 8))

    num_tiles = -(-n_rows // tn)
    ncores = 2 if num_tiles >= 2 else 1       # shard row tiles across TCs (v7x)
    spc = -(-num_tiles // ncores)             # inner steps per core

    def row_map(co, i):
        # Clamp the overflow tile of the last core; its rows are masked anyway.
        return (jnp.minimum(co * spc + i, num_tiles - 1), 0)

    out = pl.pallas_call(
        functools.partial(_center_loss_kernel, n_valid=n, tiles_per_core=spc),
        out_shape=jax.ShapeDtypeStruct((1, ncores * 128), jnp.float32),
        grid=(ncores, spc),
        in_specs=[
            pl.BlockSpec((tn, d), row_map),               # xs row tile
            pl.BlockSpec((tn, 1), row_map),               # labels row tile
            pl.BlockSpec((tn, 1), row_map),               # 1/count row tile
            pl.BlockSpec(memory_space=pl.ANY),            # center stays in HBM
        ],
        out_specs=pl.BlockSpec((1, 128), lambda co, i: (0, co)),
        scratch_shapes=[
            pltpu.VMEM((c, d), center.dtype),             # resident center copy
            pltpu.VMEM((tn, 1), jnp.float32),             # per-row accumulator
        ],
        compiler_params=pltpu.CompilerParams(
            dimension_semantics=("parallel", "arbitrary"),
            vmem_limit_bytes=_vmem_limit_bytes(),
        ),
    )(xs, ys2d, inv_cnt, center)
    return jnp.sum(out)


if __name__ == "__main__":
    # Small deterministic example: batch=8, feature_num=32, cls_num=10.
    feature_num = 32
    cls_num = 10
    batch = 8

    key = jax.random.PRNGKey(0)
    k_center, k_xs, k_ys = jax.random.split(key, 3)

    # nn.Parameter(torch.randn((cls_num, feature_num))) -> standard normal init.
    center = jax.random.normal(k_center, (cls_num, feature_num), dtype=jnp.float32)
    xs = jax.random.normal(k_xs, (batch, feature_num), dtype=jnp.float32)
    ys = jax.random.randint(k_ys, (batch,), 0, cls_num, dtype=jnp.int32)

    def ref_loss(xs_a, ys_a, center_a):
        xs_n = xs_a / jnp.maximum(
            jnp.sqrt(jnp.sum(xs_a * xs_a, axis=1, keepdims=True)), 1e-12)
        c_sel = center_a[ys_a]
        cnts = jnp.sum(
            (ys_a[:, None] == jnp.arange(center_a.shape[0])[None, :]).astype(jnp.float32),
            axis=0)
        cnt = cnts[ys_a]
        return jnp.sum(jnp.sqrt(jnp.sum((xs_n - c_sel) ** 2, axis=1)) / cnt)

    loss = center_loss(xs, ys, center)
    jax.block_until_ready(loss)
    assert jnp.allclose(loss, ref_loss(xs, ys, center), rtol=1e-5, atol=1e-5), (
        loss, ref_loss(xs, ys, center))

    # Exercise the multi-tile grid + 2-core split + ragged trailing block path.
    batch2 = 37
    xs2 = jax.random.normal(jax.random.PRNGKey(1), (batch2, feature_num),
                            dtype=jnp.float32)
    ys2 = jax.random.randint(jax.random.PRNGKey(2), (batch2,), 0, cls_num,
                             dtype=jnp.int32)
    loss2 = center_loss(xs2, ys2, center, block_n=16)
    jax.block_until_ready(loss2)
    assert jnp.allclose(loss2, ref_loss(xs2, ys2, center), rtol=1e-5, atol=1e-5), (
        loss2, ref_loss(xs2, ys2, center))

    print("KERNEL_OK")
</pallas_src>

<mosaic_0001>
module attributes {stable_mosaic.version = 11 : i64} {
  func.func @_center_loss_kernel(%arg0: i32, %arg1: i32, %arg2: memref<8x32xf32, #tpu.memory_space<vmem>>, %arg3: memref<8x1xi32, #tpu.memory_space<vmem>>, %arg4: memref<8x1xf32, #tpu.memory_space<vmem>>, %arg5: memref<10x32xf32, #tpu.memory_space<any>>, %arg6: memref<1x128xf32, #tpu.memory_space<vmem>>, %arg7: memref<10x32xf32, #tpu.memory_space<vmem>>, %arg8: memref<8x1xf32, #tpu.memory_space<vmem>>) attributes {dimension_semantics = [#tpu.dimension_semantics<parallel>, #tpu.dimension_semantics<arbitrary>], iteration_bounds = array<i64: 1, 1>, scalar_prefetch = 0 : i64, scratch_operands = 2 : i64, tpu.core_type = #tpu.core_type<tc>, window_params = [{transform_indices = @transform_0, window_bounds = array<i64: 8, 32>}, {transform_indices = @transform_1, window_bounds = array<i64: 8, 1>}, {transform_indices = @transform_2, window_bounds = array<i64: 8, 1>}, {}, {transform_indices = @transform_4, window_bounds = array<i64: 1, 128>}]} {
    %c0_i32 = arith.constant 0 : i32
    %0 = arith.cmpi eq, %arg1, %c0_i32 : i32
    %1 = arith.extui %0 : i1 to i32
    %c0_i32_0 = arith.constant 0 : i32
    %2 = arith.cmpi ne, %1, %c0_i32_0 : i32
    scf.if %2 {
      %cst_19 = arith.constant 0.000000e+00 : f32
      %43 = vector.broadcast %cst_19 : f32 to vector<8x1xf32>
      %c0_20 = arith.constant 0 : index
      %c0_21 = arith.constant 0 : index
      %44 = vector.load %arg8[%c0_20, %c0_21] : memref<8x1xf32, #tpu.memory_space<vmem>>, vector<8x1xf32>
      tpu.vector_store %arg8[%c0_20, %c0_21], %43 {strides = array<i32>} : memref<8x1xf32, #tpu.memory_space<vmem>>, vector<8x1xf32>,
      "tpu.region"() ({
        %45 = tpu.sem_alloc : memref<!tpu.dma_semaphore, #tpu.memory_space<semaphore_mem>>
        tpu.enqueue_dma source(%arg5 : memref<10x32xf32, #tpu.memory_space<any>>) target(%arg7 : memref<10x32xf32, #tpu.memory_space<vmem>>) target_semaphore(%45 : memref<!tpu.dma_semaphore, #tpu.memory_space<semaphore_mem>>)
        tpu.wait_dma2 semaphore(%45 : memref<!tpu.dma_semaphore, #tpu.memory_space<semaphore_mem>>) src(%arg5 : memref<10x32xf32, #tpu.memory_space<any>>) dst(%arg7 : memref<10x32xf32, #tpu.memory_space<vmem>>)
        tpu.yield
      }) : () -> ()
    } else {
    }
    %c0 = arith.constant 0 : index
    %c0_1 = arith.constant 0 : index
    %3 = vector.load %arg2[%c0, %c0_1] : memref<8x32xf32, #tpu.memory_space<vmem>>, vector<8x32xf32>
    %c0_2 = arith.constant 0 : index
    %c0_3 = arith.constant 0 : index
    %4 = vector.load %arg3[%c0_2, %c0_3] : memref<8x1xi32, #tpu.memory_space<vmem>>, vector<8x1xi32>
    %c0_4 = arith.constant 0 : index
    %c0_5 = arith.constant 0 : index
    %5 = vector.load %arg4[%c0_4, %c0_5] : memref<8x1xf32, #tpu.memory_space<vmem>>, vector<8x1xf32>
    %c0_6 = arith.constant 0 : index
    %c0_7 = arith.constant 0 : index
    %6 = vector.load %arg7[%c0_6, %c0_7] : memref<10x32xf32, #tpu.memory_space<vmem>>, vector<10x32xf32>
    %c1_i32 = arith.constant 1 : i32
    %7 = arith.muli %arg0, %c1_i32 : i32
    %8 = arith.addi %7, %arg1 : i32
    %c8_i32 = arith.constant 8 : i32
    %9 = arith.muli %8, %c8_i32 : i32
    %10 = tpu.iota {dimensions = array<i32: 0>} : vector<8x1xi32>
    %11 = vector.broadcast %9 : i32 to vector<8x1xi32>
    %12 = arith.addi %11, %10 : vector<8x1xi32>
    %c8_i32_8 = arith.constant 8 : i32
    %13 = vector.broadcast %c8_i32_8 : i32 to vector<8x1xi32>
    %14 = arith.cmpi slt, %12, %13 : vector<8x1xi32>
    %15 = arith.mulf %3, %3 : vector<8x32xf32>
    %cst = arith.constant dense<0.000000e+00> : vector<8xf32>
    %16 = vector.multi_reduction <add>, %15, %cst [1] : vector<8x32xf32> to vector<8xf32>
    %17 = vector.shape_cast %16 : vector<8xf32> to vector<8x1xf32>
    %cst_9 = arith.constant 1.000000e-24 : f32
    %18 = vector.broadcast %cst_9 : f32 to vector<8x1xf32>
    %19 = arith.maximumf %17, %18 : vector<8x1xf32>
    %20 = math.rsqrt %19 : vector<8x1xf32>
    %21 = vector.broadcast %20 : vector<8x1xf32> to vector<8x32xf32>
    %22 = arith.mulf %3, %21 : vector<8x32xf32>
    %23 = tpu.iota {dimensions = array<i32: 1>} : vector<8x10xi32>
    %24 = vector.broadcast %4 : vector<8x1xi32> to vector<8x10xi32>
    %25 = arith.cmpi eq, %24, %23 : vector<8x10xi32>
    %26 = arith.extui %25 : vector<8x10xi1> to vector<8x10xi32>
    %27 = arith.sitofp %26 : vector<8x10xi32> to vector<8x10xf32>
    %cst_10 = arith.constant dense<0.000000e+00> : vector<8x32xf32>
    %28 = tpu.matmul %27, %6, %cst_10 {dimension_numbers = #tpu.dot_dimension_numbers<[1], [0], [0], [1], [0, 0, 1, 1], [], []>} : vector<8x10xf32>, vector<10x32xf32>, vector<8x32xf32> -> vector<8x32xf32>
    %29 = arith.subf %22, %28 : vector<8x32xf32>
    %30 = arith.mulf %29, %29 : vector<8x32xf32>
    %cst_11 = arith.constant dense<0.000000e+00> : vector<8xf32>
    %31 = vector.multi_reduction <add>, %30, %cst_11 [1] : vector<8x32xf32> to vector<8xf32>
    %32 = vector.shape_cast %31 : vector<8xf32> to vector<8x1xf32>
    %33 = math.sqrt %32 : vector<8x1xf32>
    %c0_12 = arith.constant 0 : index
    %c0_13 = arith.constant 0 : index
    %34 = vector.load %arg8[%c0_12, %c0_13] : memref<8x1xf32, #tpu.memory_space<vmem>>, vector<8x1xf32>
    %35 = arith.mulf %33, %5 : vector<8x1xf32>
    %cst_14 = arith.constant 0.000000e+00 : f32
    %36 = vector.broadcast %cst_14 : f32 to vector<8x1xf32>
    %37 = arith.select %14, %35, %36 : vector<8x1xi1>, vector<8x1xf32>
    %38 = arith.addf %34, %37 : vector<8x1xf32>
    %c0_15 = arith.constant 0 : index
    %c0_16 = arith.constant 0 : index
    %39 = vector.load %arg8[%c0_15, %c0_16] : memref<8x1xf32, #tpu.memory_space<vmem>>, vector<8x1xf32>
    tpu.vector_store %arg8[%c0_15, %c0_16], %38 {strides = array<i32>} : memref<8x1xf32, #tpu.memory_space<vmem>>, vector<8x1xf32>,
    %c0_i32_17 = arith.constant 0 : i32
    %40 = arith.cmpi eq, %arg1, %c0_i32_17 : i32
    %41 = arith.extui %40 : i1 to i32
    %c0_i32_18 = arith.constant 0 : i32
    %42 = arith.cmpi ne, %41, %c0_i32_18 : i32
    scf.if %42 {
      %c0_19 = arith.constant 0 : index
      %c0_20 = arith.constant 0 : index
      %43 = vector.load %arg8[%c0_19, %c0_20] : memref<8x1xf32, #tpu.memory_space<vmem>>, vector<8x1xf32>
      %44 = vector.shape_cast %43 : vector<8x1xf32> to vector<1x8x1xf32>
      %cst_21 = arith.constant dense<0.000000e+00> : vector<1xf32>
      %45 = vector.multi_reduction <add>, %44, %cst_21 [1, 2] : vector<1x8x1xf32> to vector<1xf32>
      %46 = vector.shape_cast %45 : vector<1xf32> to vector<1x1x1xf32>
      %47 = vector.extract %46[0, 0, 0] : f32 from vector<1x1x1xf32>
      %48 = tpu.iota {dimensions = array<i32: 1>} : vector<1x128xi32>
      %c0_i32_22 = arith.constant 0 : i32
      %49 = vector.broadcast %c0_i32_22 : i32 to vector<1x128xi32>
      %50 = arith.cmpi eq, %48, %49 : vector<1x128xi32>
      %cst_23 = arith.constant 0.000000e+00 : f32
      %51 = vector.broadcast %47 : f32 to vector<1x128xf32>
      %52 = vector.broadcast %cst_23 : f32 to vector<1x128xf32>
      %53 = arith.select %50, %51, %52 : vector<1x128xi1>, vector<1x128xf32>
      %c0_24 = arith.constant 0 : index
      %c0_25 = arith.constant 0 : index
      %54 = vector.load %arg6[%c0_24, %c0_25] : memref<1x128xf32, #tpu.memory_space<vmem>>, vector<1x128xf32>
      tpu.vector_store %arg6[%c0_24, %c0_25], %53 {strides = array<i32>} : memref<1x128xf32, #tpu.memory_space<vmem>>, vector<1x128xf32>,
    } else {
    }
    return
  }
  func.func @transform_0(%arg0: i32, %arg1: i32) -> (i32, i32) {
    %c1_i32 = arith.constant 1 : i32
    %0 = arith.muli %arg0, %c1_i32 : i32
    %1 = arith.addi %0, %arg1 : i32
    %c0_i32 = arith.constant 0 : i32
    %2 = arith.minsi %1, %c0_i32 : i32
    %c0_i32_0 = arith.constant 0 : i32
    %c0_i32_1 = arith.constant 0 : i32
    return %2, %c0_i32_0 : i32, i32
  }
  func.func @transform_1(%arg0: i32, %arg1: i32) -> (i32, i32) {
    %c1_i32 = arith.constant 1 : i32
    %0 = arith.muli %arg0, %c1_i32 : i32
    %1 = arith.addi %0, %arg1 : i32
    %c0_i32 = arith.constant 0 : i32
    %2 = arith.minsi %1, %c0_i32 : i32
    %c0_i32_0 = arith.constant 0 : i32
    %c0_i32_1 = arith.constant 0 : i32
    return %2, %c0_i32_0 : i32, i32
  }
  func.func @transform_2(%arg0: i32, %arg1: i32) -> (i32, i32) {
    %c1_i32 = arith.constant 1 : i32
    %0 = arith.muli %arg0, %c1_i32 : i32
    %1 = arith.addi %0, %arg1 : i32
    %c0_i32 = arith.constant 0 : i32
    %2 = arith.minsi %1, %c0_i32 : i32
    %c0_i32_0 = arith.constant 0 : i32
    %c0_i32_1 = arith.constant 0 : i32
    return %2, %c0_i32_0 : i32, i32
  }
  func.func @transform_4(%arg0: i32, %arg1: i32) -> (i32, i32) {
    %c0_i32 = arith.constant 0 : i32
    %c0_i32_0 = arith.constant 0 : i32
    return %c0_i32, %arg0 : i32, i32
  }
}

</mosaic_0001>

<bundles_post_ra>
// kernel: tpu_custom_call.1
= control target key start
LH: loop header
LB: loop body
LE: loop exit
PB: predicated region body
PF: predicated region fallthrough
CT: control target
= control target key end

     0   :  { %9 = vsyncpa [#allocation5], 0  ;;  %vm101_vm0 = vcmask 7168   ;;  %v405_v0 = vmov 0.0   ;;  %s468_s0 = inlined_call_operand.vmem [shape: f32[8,32], index: 0, kind: input, shape index: {}]   ;;  %s469_s1 = inlined_call_operand.vmem [shape: s32[8,1], index: 1, kind: input, shape index: {}]   ;;  %s470_s2 = inlined_call_operand.vmem [shape: f32[8,1], index: 2, kind: input, shape index: {}]   ;;  %s471_s3 = inlined_call_operand.vmem [shape: f32[10,32], index: 3, kind: input, shape index: {}]   ;;  %s472_s4 = inlined_call_operand.hbm [shape: f32[1,128], index: 4, kind: output, shape index: {}]  }
   0x1   :  { %102 = vst.msk [vmem:[#allocation3] sm:$0xff] %vm101_vm0, %v405_v0 }
   0x2   :  { %v140_v1 = vld [vmem:[%s471_s3] sm:$0xff]  ;;  %v348_v2 = vld [vmem:[%s471_s3 + $0x8] sm:$0x3] }
   0x3   :  { %141 = vst [vmem:[#allocation2] sm:$0xff] %v140_v1  ;;  %152 = vst [vmem:[#allocation2 + $0x8] sm:$0x3] %v348_v2 }
   0x4   :  { %156 = vsyncadd [#allocation6], 160 }
   0x5   :  { %401 = dma.done.wait [#allocation6], 160 }
   0x6   :  { %402 = vsyncadd [#allocation6], 4294967136  ;;  %v161_v3 = vld [vmem:[%s469_s1] sm:$0xff]  ;;  %v406_v6 = vmov 0   ;;  %v407_v7 = vmov 0.0|0.0   ;;  %vm192_vm1 = vcmask 1041408   ;;  %v180_v12 = vlaneseq }
   0x7   :  { %374 = vset.pattern.permute.xlu0 %v406_v6  ;;  %362 = vmatprep.subr.bf16.mxu0 %v407_v7  ;;  %vm408_vm2 = vmmov 1   ;;  %vm409_vm4 = vmmov 0   ;;  %v160_v9 = vld [vmem:[%s468_s0] sm:$0xff]  ;;  %vm173_vm5 = vcmask 261120   ;;  %vm188_vm6 = vcmask 80896  }
   0x8   :  { %183 = vperm.xlu0 %374, %v161_v3   ;;  %vm364_vm3 = vmpackc.low %vm192_vm1, %vm408_vm2  ;;  %359 = vmatprep.mubr.msk.f32.mxu0 %vm409_vm4, %v405_v0  ;;  %v172_v10 = vmul.f32 %v160_v9, %v160_v9  ;;  %v181_v13 = vand.u32 127, %v180_v12  ;;  %v162_v28 = vld [vmem:[%s470_s2] sm:$0xff]  ;;  %v278_v31 = vld [vmem:[#allocation3] sm:$0xff]  ;;  %s410_s2 = smov [#allocation4]  }
   0x9   :  { %s308_s22 = sshll.u32 %s410_s2, 4  ;;  %s309_s22 = int_to_ptr.vmem [resolvable:$true] %s308_s22 }
   0xa   :  { %v163_v4 = vld [vmem:[#allocation2] sm:$0xff]  ;;  %v164_v5 = vld [vmem:[#allocation2 + $0x8] sm:$0x3]  ;;  %v174_v11 = vsel %vm173_vm5, %v172_v10, 0.0  ;;  %vm298_vm10 = vcmp.eq.s32.totalorder %v181_v13, 0  ;;  %s379_s24 = scalar_lea.vmem %s309_s22, 16  ;;  %p384_p1 = scmp.lt.s32.totalorder %s309_s22, %s309_s22 }
   0xb   :  { %v363_v8 = vpack.c.bf16 %v164_v5, %v163_v4  ;;  %p380_p0 = scmp.ne.s32.totalorder %s309_s22, %s379_s24  ;;  %s383_s25 = scalar_lea.vmem %s309_s22, 32 }
   0xc   :  { %p385_p2 = scmp.lt.s32.totalorder %s383_s25, %s379_s24 }
   0xd   :  { %365 = vmatpush3.bf16.msk.msra.mxu0 %vm364_vm3, %v363_v8 }
   0xe   :  { %p386_p3 = por %p385_p2, %p384_p1 }
  0x10   :  { %p387_p4 = pnand %p386_p3, %p380_p0 }
  0x27   :  { %175 = vadd.xlane.f32.xlu0 %v174_v11 }
  0x87   :  { %v184_v14 = vpop.permute.xlu0 %183 }
  0x88   :  { %vm185_vm7 = vcmp.eq.s32.totalorder %v184_v14, %v181_v13 }
  0x89   :  { %v349_v15 = vsel %vm185_vm7, 1.0, %v405_v0 }
  0x8a   :  { %360 = vmatmul.mubr.msk.f32.vlgmr.msra.gmra.mrb[0].mxu0 %vm188_vm6, %v349_v15 }
  0xb4   :  { %v176_v16 = vpop.xlane.xlu0 %175 }
  0xb5   :  { %v177_v17 = vmax.f32 %v176_v16, 1e-24 }
  0xb7   :  { %375 = vrsqrt.f32 %v177_v17 }
  0xc1   :  { %v376_v18 = vpop.eup %375 }
  0xc2   :  { %v179_v19 = vmul.f32 %v376_v18, %v160_v9 }
 0x15d   :  { %v262_v20 = vpop.f32.mrb[0].mxu0 }
 0x15e   :  { %v266_v21 = vsub.f32 %v179_v19, %v262_v20  ;;  %v361_v22 = vpop.f32.mrb[1].mxu0 }
 0x160   :  { %v267_v23 = vmul.f32 %v266_v21, %v266_v21 }
 0x162   :  { %v268_v24 = vsel %vm173_vm5, %v267_v23, 0.0 }
 0x163   :  { %269 = vadd.xlane.f32.xlu1 %v268_v24 }
 0x1f0   :  { %v270_v25 = vpop.xlane.xlu1 %269 }
 0x1f1   :  { %377 = vrsqrt.f32 %v270_v25  ;;  %vm273_vm8 = vcmp.eq.f32.partialorder %v270_v25, inf  ;;  %v276_v29 = vand.u32 2147483648, %v270_v25  ;;  %vm275_vm9 = vcmp.eq.f32.partialorder %v270_v25, 0.0 }
 0x1fb   :  { %v378_v26 = vpop.eup %377 }
 0x1fc   :  { %v272_v27 = vmul.f32 %v378_v26, %v270_v25 }
 0x1fe   :  { %v274_v30 = vsel %vm273_vm8, %v270_v25, %v272_v27 }
 0x1ff   :  { %v277_v32 = vsel %vm275_vm9, %v276_v29, %v274_v30 }
 0x200   :  { %v279_v33 = vmul.f32 %v277_v32, %v162_v28 }
 0x202   :  { %v281_v34 = vadd.f32 %v279_v33, %v278_v31 }
 0x204   :  { %283 = vst.msk [vmem:[#allocation3] sm:$0xff] %vm101_vm0, %v281_v34 }
 0x20b   :  { %v287_v35 = vld [vmem:[#allocation3] sm:$0xff] }
 0x20c   :  { %v288_v36 = vsel %vm101_vm0, %v287_v35, 0.0 }
 0x20d   :  { %289 = vadd.xlane.f32.xlu1 %v288_v36 }
 0x29a   :  { %v290_v37 = vpop.xlane.xlu1 %289 }
 0x29b   :  { %v291_v38 = vrot.slane %v290_v37, 4 }
 0x29d   :  { %v292_v39 = vadd.f32 %v291_v38, %v290_v37 }
 0x29f   :  { %v293_v40 = vrot.slane %v292_v39, 2 }
 0x2a1   :  { %v294_v41 = vadd.f32 %v293_v40, %v292_v39 }
 0x2a3   :  { %v295_v42 = vrot.slane %v294_v41, 1 }
 0x2a5   :  { %v296_v43 = vadd.f32 %v295_v42, %v294_v41 }
 0x2a7   :  { %366 = vpush %v296_v43 }
 0x2d8   :  { %s367_s23 = spop %366 }
 0x2d9   :  { %v299_v44 = vstv %s367_s23 }
 0x2da   :  { %v300_v45 = vsel %vm298_vm10, %v299_v44, 0.0 }
 0x2db   :  { %301 = vst [vmem:[#allocation4] sm:$0x1] %v300_v45 }
 0x2dc   :  { %390 = shalt.err (!%p387_p4)
}
 0x2dd   :  { %s391_s28 = scalar_lea.hbm %s472_s4, 16 }
 0x2de   :  { %p392_p5 = scmp.ne.s32.totalorder %s472_s4, %s391_s28  ;;  %p395_p6 = scmp.lt.u32.totalorder %s391_s28, %s472_s4 }
 0x2e0   :  { %p397_p7 = pnand %p395_p6, %p392_p5 }
 0x2e2   :  { %400 = shalt.err (!%p397_p7)
}
 0x2e3   :  { %311 = dma.vmem_to_hbm [thread:$0]  %s309_s22, 16, %s472_s4, [#allocation5]  }
 0x2e4   :  { %403 = dma.done.wait [#allocation5], 16  }
 0x2e5   :  { %404 = vsyncadd [#allocation5], 4294967280 }
 0x2e6   :  { %315 = vsyncpa [#allocation5], 1 }

</bundles_post_ra>
